<compile_context>
chip_gen: v6e
topology: v6e:2x2x1
jax: 0.10.0
libtpu: 0.0.40
codegen_flags: <defaults>
</compile_context>

<pallas_src>
import functools

import jax
import jax.numpy as jnp
from jax.experimental import pallas as pl
from jax.experimental.pallas import tpu as pltpu


# ---------------------------------------------------------------------------
# Projection kernel: e1 = PReLU(W1 x + b1), e2 = PReLU(W2 x + b2),
# asm = PReLU(Wa x + ba), all channel-major (C*, HW-tile), emitted as bf16.
# ---------------------------------------------------------------------------
def _proj_kernel(alpha_ref,                     # SMEM (3,) PReLU slopes
                 x_ref,                         # VMEM (1, C, T)
                 w1_ref, b1_ref,                # (Cr, C), (Cr, 1)
                 w2_ref, b2_ref,                # (Cr, C), (Cr, 1)
                 wa_ref, ba_ref,                # (C, C),  (C, 1)
                 e1_ref, e2_ref, ea_ref):       # bf16 outputs
    x = x_ref[0].astype(jnp.bfloat16)           # (C, T) bf16 MXU operand

    def proj(w_ref, b_ref, a, out_ref):
        y = jnp.dot(w_ref[...], x, preferred_element_type=jnp.float32) + b_ref[...]
        y = jnp.maximum(y, 0.0) + a * jnp.minimum(y, 0.0)
        out_ref[0] = y.astype(jnp.bfloat16)

    proj(w1_ref, b1_ref, alpha_ref[0], e1_ref)
    proj(w2_ref, b2_ref, alpha_ref[1], e2_ref)
    proj(wa_ref, ba_ref, alpha_ref[2], ea_ref)


# ---------------------------------------------------------------------------
# Flash-style attention kernel over precomputed bf16 embeddings.
#   grid = (N, HWp//tq, HWp//tk); key axis last, 'arbitrary'.
# ---------------------------------------------------------------------------
def _nla_kernel(res_scale, hw_valid, tk, exp_dtype,
                xq_ref,                          # (1, C, TQ)  residual tile of x
                e1_ref,                          # (1, Cr, TQ) bf16 query embedding
                e2_ref,                          # (1, Cr, TK) bf16 key embedding
                ea_ref,                          # (1, C, TK)  bf16 assembly (values)
                o_ref,                           # (1, C, TQ)
                m_sc, l_sc,                      # (1, TQ) running max / sum (f32)
                acc_sc):                         # (C, TQ) output accumulator (f32)
    k = pl.program_id(2)

    @pl.when(k == 0)
    def _init():
        m_sc[...] = jnp.full_like(m_sc, -jnp.inf)
        l_sc[...] = jnp.zeros_like(l_sc)
        acc_sc[...] = jnp.zeros_like(acc_sc)

    # score[k, q] = <e2[:, k], e1[:, q]> ; bf16 operands, f32 accumulation (MXU).
    s = jax.lax.dot_general(
        e2_ref[0], e1_ref[0], dimension_numbers=(((0,), (0,)), ((), ())),
        preferred_element_type=jnp.float32)                       # (TK, TQ) f32

    if hw_valid is not None:                                      # padded keys -> -inf
        rows = jax.lax.broadcasted_iota(jnp.int32, s.shape, 0)
        s = jnp.where(rows + k * tk < hw_valid, s, -jnp.inf)

    # Online softmax over the key (sublane) axis.
    m_prev = m_sc[...]
    m_new = jnp.maximum(m_prev, jnp.max(s, axis=0, keepdims=True))  # (1, TQ)
    alpha = jnp.exp(m_prev - m_new)                                 # (1, TQ) f32
    p = jnp.exp((s - m_new).astype(exp_dtype))                      # (TK, TQ)
    # Row-sum and running sum stay in f32 (bf16 accumulation would lose precision).
    l_sc[...] = alpha * l_sc[...] + jnp.sum(
        p.astype(jnp.float32), axis=0, keepdims=True)
    # P @ V on the MXU: bf16 x bf16 -> f32 accumulation.
    acc_sc[...] = alpha * acc_sc[...] + jnp.dot(
        ea_ref[0], p.astype(jnp.bfloat16), preferred_element_type=jnp.float32)
    m_sc[...] = m_new

    @pl.when(k == pl.num_programs(2) - 1)
    def _finalize():
        inv_l = pl.reciprocal(l_sc[...], approx=True)               # (1, TQ)
        o_ref[0] = (res_scale * (acc_sc[...] * inv_l)
                    + xq_ref[0].astype(jnp.float32)).astype(o_ref.dtype)


# ---------------------------------------------------------------------------
# Wrapper
# ---------------------------------------------------------------------------
def _device_kind():
    try:
        return jax.devices()[0].device_kind.lower()
    except Exception:
        return ""


def _pick_tile(hw, cap):
    """Largest 128-multiple tile <= cap dividing hw (hw is a multiple of 128)."""
    t = min(cap, hw)
    while hw % t != 0:
        t -= 128
    return t


def nonlocal_attention(x_nchw, params, res_scale=1.0):
    """params = (w1, b1, w2, b2, wa, ba, alphas) with conv-style (Cout, Cin) weights."""
    w1, b1, w2, b2, wa, ba, alphas = params
    N, C, H, W = x_nchw.shape
    HW = H * W
    Cr = w1.shape[0]

    kind = _device_kind()
    big_vmem = ("v5" in kind) or ("v6" in kind)          # 128 MiB VMEM parts
    cap = 1024 if big_vmem else 512                      # v7x (64 MiB) stays at 512
    vmem_limit = (64 if big_vmem else 48) * 1024 * 1024
    # bf16 EUP exists on v6e/v7x; v5e (and older) must keep exp in f32.
    exp_dtype = jnp.bfloat16 if ("v6" in kind or "v7" in kind) else jnp.float32

    # Channel-major layout; pad HW to a multiple of 128 (lane width).
    x = x_nchw.reshape(N, C, HW)
    HWp = ((HW + 127) // 128) * 128
    if HWp != HW:
        x_p = jnp.pad(x, ((0, 0), (0, 0), (0, HWp - HW)))
        hw_valid = HW
    else:
        x_p = x
        hw_valid = None

    tq = _pick_tile(HWp, cap)
    tk = _pick_tile(HWp, cap)
    tp = _pick_tile(HWp, 512)

    w1b = w1.astype(jnp.bfloat16)
    w2b = w2.astype(jnp.bfloat16)
    wab = wa.astype(jnp.bfloat16)
    b1c = b1.reshape(Cr, 1).astype(jnp.float32)
    b2c = b2.reshape(Cr, 1).astype(jnp.float32)
    bac = ba.reshape(C, 1).astype(jnp.float32)

    # --- 1) Precompute the three embeddings (bf16, channel-major) -----------
    e1, e2, ea = pl.pallas_call(
        _proj_kernel,
        out_shape=(jax.ShapeDtypeStruct((N, Cr, HWp), jnp.bfloat16),
                   jax.ShapeDtypeStruct((N, Cr, HWp), jnp.bfloat16),
                   jax.ShapeDtypeStruct((N, C, HWp), jnp.bfloat16)),
        grid_spec=pltpu.PrefetchScalarGridSpec(
            num_scalar_prefetch=0,
            grid=(N, HWp // tp),
            in_specs=[
                pl.BlockSpec(memory_space=pltpu.MemorySpace.SMEM),   # alphas
                pl.BlockSpec((1, C, tp), lambda n, t: (n, 0, t)),    # x tile
                pl.BlockSpec((Cr, C), lambda n, t: (0, 0)),          # W1
                pl.BlockSpec((Cr, 1), lambda n, t: (0, 0)),          # b1
                pl.BlockSpec((Cr, C), lambda n, t: (0, 0)),          # W2
                pl.BlockSpec((Cr, 1), lambda n, t: (0, 0)),          # b2
                pl.BlockSpec((C, C), lambda n, t: (0, 0)),           # Wa
                pl.BlockSpec((C, 1), lambda n, t: (0, 0)),           # ba
            ],
            out_specs=[
                pl.BlockSpec((1, Cr, tp), lambda n, t: (n, 0, t)),
                pl.BlockSpec((1, Cr, tp), lambda n, t: (n, 0, t)),
                pl.BlockSpec((1, C, tp), lambda n, t: (n, 0, t)),
            ],
        ),
        compiler_params=pltpu.CompilerParams(
            dimension_semantics=("parallel", "parallel"),
            vmem_limit_bytes=vmem_limit),
    )(alphas, x_p, w1b, b1c, w2b, b2c, wab, bac)

    # --- 2) Flash attention over the embeddings ------------------------------
    kernel = functools.partial(_nla_kernel, float(res_scale), hw_valid, tk, exp_dtype)
    out = pl.pallas_call(
        kernel,
        out_shape=jax.ShapeDtypeStruct((N, C, HWp), x.dtype),
        grid_spec=pltpu.PrefetchScalarGridSpec(
            num_scalar_prefetch=0,
            grid=(N, HWp // tq, HWp // tk),
            in_specs=[
                pl.BlockSpec((1, C, tq), lambda n, q, k: (n, 0, q)),   # x (residual)
                pl.BlockSpec((1, Cr, tq), lambda n, q, k: (n, 0, q)),  # e1 query tile
                pl.BlockSpec((1, Cr, tk), lambda n, q, k: (n, 0, k)),  # e2 key tile
                pl.BlockSpec((1, C, tk), lambda n, q, k: (n, 0, k)),   # asm key tile
            ],
            out_specs=pl.BlockSpec((1, C, tq), lambda n, q, k: (n, 0, q)),
            scratch_shapes=[
                pltpu.VMEM((1, tq), jnp.float32),   # running max
                pltpu.VMEM((1, tq), jnp.float32),   # running sum
                pltpu.VMEM((C, tq), jnp.float32),   # output accumulator
            ],
        ),
        compiler_params=pltpu.CompilerParams(
            dimension_semantics=("parallel", "parallel", "arbitrary"),
            vmem_limit_bytes=vmem_limit),
    )(x_p, e1, e2, ea)

    if hw_valid is not None:
        out = out[:, :, :HW]
    return out.reshape(N, C, H, W)


# ---------------------------------------------------------------------------
# Pure-JAX reference and synthetic parameters (for correctness checking)
# ---------------------------------------------------------------------------
def reference(x_nchw, params, res_scale=1.0):
    w1, b1, w2, b2, wa, ba, alphas = params

    def conv1x1_prelu(x, w, b, a):
        y = jnp.einsum('nchw,oc->nohw', x, w) + b[None, :, None, None]
        return jnp.maximum(y, 0.0) + a * jnp.minimum(y, 0.0)

    e1 = conv1x1_prelu(x_nchw, w1, b1, alphas[0])
    e2 = conv1x1_prelu(x_nchw, w2, b2, alphas[1])
    asm = conv1x1_prelu(x_nchw, wa, ba, alphas[2])
    N, Cr, H, W = e1.shape
    e1 = jnp.transpose(e1, (0, 2, 3, 1)).reshape(N, H * W, Cr)
    e2 = e2.reshape(N, Cr, H * W)
    score = jax.nn.softmax(jnp.einsum('nqc,nck->nqk', e1, e2), axis=2)
    asm = jnp.transpose(asm.reshape(N, -1, H * W), (0, 2, 1))
    xf = jnp.einsum('nqk,nkc->nqc', score, asm)
    return res_scale * jnp.transpose(xf, (0, 2, 1)).reshape(N, -1, H, W) + x_nchw


def make_params(key, channel, reduction):
    cr = channel // reduction
    k1, k2, k3, k4, k5, k6 = jax.random.split(key, 6)
    scale = 1.0 / jnp.sqrt(channel)
    w1 = jax.random.uniform(k1, (cr, channel), jnp.float32, -scale, scale)
    b1 = jax.random.uniform(k2, (cr,), jnp.float32, -scale, scale)
    w2 = jax.random.uniform(k3, (cr, channel), jnp.float32, -scale, scale)
    b2 = jax.random.uniform(k4, (cr,), jnp.float32, -scale, scale)
    wa = jax.random.uniform(k5, (channel, channel), jnp.float32, -scale, scale)
    ba = jax.random.uniform(k6, (channel,), jnp.float32, -scale, scale)
    alphas = jnp.full((3,), 0.25, jnp.float32)   # nn.PReLU() default slope
    return (w1, b1, w2, b2, wa, ba, alphas)


if __name__ == "__main__":
    # Small shapes consistent with the module: channel=4, reduction=2, 16x16 spatial.
    N, C, H, W = 2, 4, 16, 16
    reduction = 2
    res_scale = 1.0

    key = jax.random.PRNGKey(0)
    kx, kp = jax.random.split(key)
    x = jax.random.normal(kx, (N, C, H, W), jnp.float32)
    params = make_params(kp, C, reduction)

    out = jax.block_until_ready(nonlocal_attention(x, params, res_scale))
    ref = reference(x, params, res_scale)
    assert out.shape == ref.shape == (N, C, H, W)
    # bf16 MXU operands (+ optional bf16 exp) + approx reciprocal bound accuracy
    # to ~1e-2 relative on the attention term.
    assert jnp.allclose(out, ref, rtol=3e-2, atol=3e-2), "mismatch vs JAX reference"

    # Also exercise the non-128-multiple spatial path (HW padded + key masking).
    x2 = jax.random.normal(jax.random.PRNGKey(1), (1, C, 10, 10), jnp.float32)
    out2 = jax.block_until_ready(nonlocal_attention(x2, params, res_scale))
    ref2 = reference(x2, params, res_scale)
    assert jnp.allclose(out2, ref2, rtol=3e-2, atol=3e-2), "mismatch (padded path)"

    print("KERNEL_OK")
</pallas_src>

<mosaic_0001>
module attributes {stable_mosaic.version = 11 : i64} {
  func.func @_proj_kernel(%arg0: i32, %arg1: i32, %arg2: memref<3xf32, #tpu.memory_space<smem>>, %arg3: memref<1x4x256xf32, #tpu.memory_space<vmem>>, %arg4: memref<2x4xbf16, #tpu.memory_space<vmem>>, %arg5: memref<2x1xf32, #tpu.memory_space<vmem>>, %arg6: memref<2x4xbf16, #tpu.memory_space<vmem>>, %arg7: memref<2x1xf32, #tpu.memory_space<vmem>>, %arg8: memref<4x4xbf16, #tpu.memory_space<vmem>>, %arg9: memref<4x1xf32, #tpu.memory_space<vmem>>, %arg10: memref<1x2x256xbf16, #tpu.memory_space<vmem>>, %arg11: memref<1x2x256xbf16, #tpu.memory_space<vmem>>, %arg12: memref<1x4x256xbf16, #tpu.memory_space<vmem>>) attributes {dimension_semantics = [#tpu.dimension_semantics<parallel>, #tpu.dimension_semantics<parallel>], iteration_bounds = array<i64: 2, 1>, scalar_prefetch = 0 : i64, scratch_operands = 0 : i64, tpu.core_type = #tpu.core_type<tc>, window_params = [{transform_indices = @transform_0, window_bounds = array<i64: 3>}, {transform_indices = @transform_1, window_bounds = array<i64: 1, 4, 256>}, {pipeline_mode = #tpu.pipeline_mode<synchronous>, transform_indices = @transform_2, window_bounds = array<i64: 2, 4>}, {pipeline_mode = #tpu.pipeline_mode<synchronous>, transform_indices = @transform_3, window_bounds = array<i64: 2, 1>}, {pipeline_mode = #tpu.pipeline_mode<synchronous>, transform_indices = @transform_4, window_bounds = array<i64: 2, 4>}, {pipeline_mode = #tpu.pipeline_mode<synchronous>, transform_indices = @transform_5, window_bounds = array<i64: 2, 1>}, {pipeline_mode = #tpu.pipeline_mode<synchronous>, transform_indices = @transform_6, window_bounds = array<i64: 4, 4>}, {pipeline_mode = #tpu.pipeline_mode<synchronous>, transform_indices = @transform_7, window_bounds = array<i64: 4, 1>}, {transform_indices = @transform_8, window_bounds = array<i64: 1, 2, 256>}, {transform_indices = @transform_9, window_bounds = array<i64: 1, 2, 256>}, {transform_indices = @transform_10, window_bounds = array<i64: 1, 4, 256>}]} {
    %c0 = arith.constant 0 : index
    %c0_0 = arith.constant 0 : index
    %c0_1 = arith.constant 0 : index
    %0 = vector.load %arg3[%c0, %c0_0, %c0_1] : memref<1x4x256xf32, #tpu.memory_space<vmem>>, vector<1x4x256xf32>
    %1 = vector.shape_cast %0 : vector<1x4x256xf32> to vector<4x256xf32>
    %2 = arith.truncf %1 : vector<4x256xf32> to vector<4x256xbf16>
    %c0_2 = arith.constant 0 : index
    %3 = memref.load %arg2[%c0_2] : memref<3xf32, #tpu.memory_space<smem>>
    %c0_3 = arith.constant 0 : index
    %c0_4 = arith.constant 0 : index
    %4 = vector.load %arg4[%c0_3, %c0_4] : memref<2x4xbf16, #tpu.memory_space<vmem>>, vector<2x4xbf16>
    %cst = arith.constant dense<0.000000e+00> : vector<2x256xf32>
    %5 = tpu.matmul %4, %2, %cst {dimension_numbers = #tpu.dot_dimension_numbers<[1], [0], [0], [1], [0, 0, 1, 1], [], []>} : vector<2x4xbf16>, vector<4x256xbf16>, vector<2x256xf32> -> vector<2x256xf32>
    %c0_5 = arith.constant 0 : index
    %c0_6 = arith.constant 0 : index
    %6 = vector.load %arg5[%c0_5, %c0_6] : memref<2x1xf32, #tpu.memory_space<vmem>>, vector<2x1xf32>
    %7 = vector.broadcast %6 : vector<2x1xf32> to vector<2x256xf32>
    %8 = arith.addf %5, %7 : vector<2x256xf32>
    %cst_7 = arith.constant 0.000000e+00 : f32
    %9 = vector.broadcast %cst_7 : f32 to vector<2x256xf32>
    %10 = arith.maximumf %8, %9 : vector<2x256xf32>
    %cst_8 = arith.constant 0.000000e+00 : f32
    %11 = vector.broadcast %cst_8 : f32 to vector<2x256xf32>
    %12 = arith.minimumf %8, %11 : vector<2x256xf32>
    %13 = vector.broadcast %3 : f32 to vector<2x256xf32>
    %14 = arith.mulf %13, %12 : vector<2x256xf32>
    %15 = arith.addf %10, %14 : vector<2x256xf32>
    %16 = arith.truncf %15 : vector<2x256xf32> to vector<2x256xbf16>
    %c0_9 = arith.constant 0 : index
    %c0_10 = arith.constant 0 : index
    %c0_11 = arith.constant 0 : index
    %17 = vector.load %arg10[%c0_9, %c0_10, %c0_11] : memref<1x2x256xbf16, #tpu.memory_space<vmem>>, vector<1x2x256xbf16>
    %18 = vector.shape_cast %17 : vector<1x2x256xbf16> to vector<2x256xbf16>
    %19 = vector.shape_cast %16 : vector<2x256xbf16> to vector<1x2x256xbf16>
    tpu.vector_store %arg10[%c0_9, %c0_10, %c0_11], %19 {strides = array<i32>} : memref<1x2x256xbf16, #tpu.memory_space<vmem>>, vector<1x2x256xbf16>,
    %c1 = arith.constant 1 : index
    %20 = memref.load %arg2[%c1] : memref<3xf32, #tpu.memory_space<smem>>
    %c0_12 = arith.constant 0 : index
    %c0_13 = arith.constant 0 : index
    %21 = vector.load %arg6[%c0_12, %c0_13] : memref<2x4xbf16, #tpu.memory_space<vmem>>, vector<2x4xbf16>
    %cst_14 = arith.constant dense<0.000000e+00> : vector<2x256xf32>
    %22 = tpu.matmul %21, %2, %cst_14 {dimension_numbers = #tpu.dot_dimension_numbers<[1], [0], [0], [1], [0, 0, 1, 1], [], []>} : vector<2x4xbf16>, vector<4x256xbf16>, vector<2x256xf32> -> vector<2x256xf32>
    %c0_15 = arith.constant 0 : index
    %c0_16 = arith.constant 0 : index
    %23 = vector.load %arg7[%c0_15, %c0_16] : memref<2x1xf32, #tpu.memory_space<vmem>>, vector<2x1xf32>
    %24 = vector.broadcast %23 : vector<2x1xf32> to vector<2x256xf32>
    %25 = arith.addf %22, %24 : vector<2x256xf32>
    %cst_17 = arith.constant 0.000000e+00 : f32
    %26 = vector.broadcast %cst_17 : f32 to vector<2x256xf32>
    %27 = arith.maximumf %25, %26 : vector<2x256xf32>
    %cst_18 = arith.constant 0.000000e+00 : f32
    %28 = vector.broadcast %cst_18 : f32 to vector<2x256xf32>
    %29 = arith.minimumf %25, %28 : vector<2x256xf32>
    %30 = vector.broadcast %20 : f32 to vector<2x256xf32>
    %31 = arith.mulf %30, %29 : vector<2x256xf32>
    %32 = arith.addf %27, %31 : vector<2x256xf32>
    %33 = arith.truncf %32 : vector<2x256xf32> to vector<2x256xbf16>
    %c0_19 = arith.constant 0 : index
    %c0_20 = arith.constant 0 : index
    %c0_21 = arith.constant 0 : index
    %34 = vector.load %arg11[%c0_19, %c0_20, %c0_21] : memref<1x2x256xbf16, #tpu.memory_space<vmem>>, vector<1x2x256xbf16>
    %35 = vector.shape_cast %34 : vector<1x2x256xbf16> to vector<2x256xbf16>
    %36 = vector.shape_cast %33 : vector<2x256xbf16> to vector<1x2x256xbf16>
    tpu.vector_store %arg11[%c0_19, %c0_20, %c0_21], %36 {strides = array<i32>} : memref<1x2x256xbf16, #tpu.memory_space<vmem>>, vector<1x2x256xbf16>,
    %c2 = arith.constant 2 : index
    %37 = memref.load %arg2[%c2] : memref<3xf32, #tpu.memory_space<smem>>
    %c0_22 = arith.constant 0 : index
    %c0_23 = arith.constant 0 : index
    %38 = vector.load %arg8[%c0_22, %c0_23] : memref<4x4xbf16, #tpu.memory_space<vmem>>, vector<4x4xbf16>
    %cst_24 = arith.constant dense<0.000000e+00> : vector<4x256xf32>
    %39 = tpu.matmul %38, %2, %cst_24 {dimension_numbers = #tpu.dot_dimension_numbers<[1], [0], [0], [1], [0, 0, 1, 1], [], []>} : vector<4x4xbf16>, vector<4x256xbf16>, vector<4x256xf32> -> vector<4x256xf32>
    %c0_25 = arith.constant 0 : index
    %c0_26 = arith.constant 0 : index
    %40 = vector.load %arg9[%c0_25, %c0_26] : memref<4x1xf32, #tpu.memory_space<vmem>>, vector<4x1xf32>
    %41 = vector.broadcast %40 : vector<4x1xf32> to vector<4x256xf32>
    %42 = arith.addf %39, %41 : vector<4x256xf32>
    %cst_27 = arith.constant 0.000000e+00 : f32
    %43 = vector.broadcast %cst_27 : f32 to vector<4x256xf32>
    %44 = arith.maximumf %42, %43 : vector<4x256xf32>
    %cst_28 = arith.constant 0.000000e+00 : f32
    %45 = vector.broadcast %cst_28 : f32 to vector<4x256xf32>
    %46 = arith.minimumf %42, %45 : vector<4x256xf32>
    %47 = vector.broadcast %37 : f32 to vector<4x256xf32>
    %48 = arith.mulf %47, %46 : vector<4x256xf32>
    %49 = arith.addf %44, %48 : vector<4x256xf32>
    %50 = arith.truncf %49 : vector<4x256xf32> to vector<4x256xbf16>
    %c0_29 = arith.constant 0 : index
    %c0_30 = arith.constant 0 : index
    %c0_31 = arith.constant 0 : index
    %51 = vector.load %arg12[%c0_29, %c0_30, %c0_31] : memref<1x4x256xbf16, #tpu.memory_space<vmem>>, vector<1x4x256xbf16>
    %52 = vector.shape_cast %51 : vector<1x4x256xbf16> to vector<4x256xbf16>
    %53 = vector.shape_cast %50 : vector<4x256xbf16> to vector<1x4x256xbf16>
    tpu.vector_store %arg12[%c0_29, %c0_30, %c0_31], %53 {strides = array<i32>} : memref<1x4x256xbf16, #tpu.memory_space<vmem>>, vector<1x4x256xbf16>,
    return
  }
  func.func @transform_0(%arg0: i32, %arg1: i32) -> i32 {
    %c0_i32 = arith.constant 0 : i32
    %c0_i32_0 = arith.constant 0 : i32
    return %c0_i32 : i32
  }
  func.func @transform_1(%arg0: i32, %arg1: i32) -> (i32, i32, i32) {
    %c0_i32 = arith.constant 0 : i32
    %c0_i32_0 = arith.constant 0 : i32
    return %arg0, %c0_i32, %arg1 : i32, i32, i32
  }
  func.func @transform_2(%arg0: i32, %arg1: i32) -> (i32, i32) {
    %c0_i32 = arith.constant 0 : i32
    %c0_i32_0 = arith.constant 0 : i32
    %c0_i32_1 = arith.constant 0 : i32
    return %c0_i32, %c0_i32_0 : i32, i32
  }
  func.func @transform_3(%arg0: i32, %arg1: i32) -> (i32, i32) {
    %c0_i32 = arith.constant 0 : i32
    %c0_i32_0 = arith.constant 0 : i32
    %c0_i32_1 = arith.constant 0 : i32
    return %c0_i32, %c0_i32_0 : i32, i32
  }
  func.func @transform_4(%arg0: i32, %arg1: i32) -> (i32, i32) {
    %c0_i32 = arith.constant 0 : i32
    %c0_i32_0 = arith.constant 0 : i32
    %c0_i32_1 = arith.constant 0 : i32
    return %c0_i32, %c0_i32_0 : i32, i32
  }
  func.func @transform_5(%arg0: i32, %arg1: i32) -> (i32, i32) {
    %c0_i32 = arith.constant 0 : i32
    %c0_i32_0 = arith.constant 0 : i32
    %c0_i32_1 = arith.constant 0 : i32
    return %c0_i32, %c0_i32_0 : i32, i32
  }
  func.func @transform_6(%arg0: i32, %arg1: i32) -> (i32, i32) {
    %c0_i32 = arith.constant 0 : i32
    %c0_i32_0 = arith.constant 0 : i32
    %c0_i32_1 = arith.constant 0 : i32
    return %c0_i32, %c0_i32_0 : i32, i32
  }
  func.func @transform_7(%arg0: i32, %arg1: i32) -> (i32, i32) {
    %c0_i32 = arith.constant 0 : i32
    %c0_i32_0 = arith.constant 0 : i32
    %c0_i32_1 = arith.constant 0 : i32
    return %c0_i32, %c0_i32_0 : i32, i32
  }
  func.func @transform_8(%arg0: i32, %arg1: i32) -> (i32, i32, i32) {
    %c0_i32 = arith.constant 0 : i32
    %c0_i32_0 = arith.constant 0 : i32
    return %arg0, %c0_i32, %arg1 : i32, i32, i32
  }
  func.func @transform_9(%arg0: i32, %arg1: i32) -> (i32, i32, i32) {
    %c0_i32 = arith.constant 0 : i32
    %c0_i32_0 = arith.constant 0 : i32
    return %arg0, %c0_i32, %arg1 : i32, i32, i32
  }
  func.func @transform_10(%arg0: i32, %arg1: i32) -> (i32, i32, i32) {
    %c0_i32 = arith.constant 0 : i32
    %c0_i32_0 = arith.constant 0 : i32
    return %arg0, %c0_i32, %arg1 : i32, i32, i32
  }
}

</mosaic_0001>

<bundles_post_ra>
// kernel: tpu_custom_call.1
= control target key start
LH: loop header
LB: loop body
LE: loop exit
PB: predicated region body
PF: predicated region fallthrough
CT: control target
= control target key end

     0   :  { %s1552_s0 = inlined_call_operand.vmem [shape: f32[3], index: 0, kind: input, shape index: {}]   ;;  %s1553_s1 = inlined_call_operand.hbm [shape: f32[2,4,256], index: 1, kind: input, shape index: {}]   ;;  %s1554_s2 = inlined_call_operand.vmem [shape: bf16[2,4], index: 2, kind: input, shape index: {}]   ;;  %s1555_s3 = inlined_call_operand.vmem [shape: f32[2,1], index: 3, kind: input, shape index: {}]   ;;  %s1556_s4 = inlined_call_operand.vmem [shape: bf16[2,4], index: 4, kind: input, shape index: {}]   ;;  %s1557_s5 = inlined_call_operand.vmem [shape: f32[2,1], index: 5, kind: input, shape index: {}]   ;;  %s1558_s6 = inlined_call_operand.vmem [shape: bf16[4,4], index: 6, kind: input, shape index: {}]   ;;  %s1559_s7 = inlined_call_operand.vmem [shape: f32[4,1], index: 7, kind: input, shape index: {}]   ;;  %s1560_s8 = inlined_call_operand.hbm [shape: bf16[2,2,256], index: 8, kind: output, shape index: {0}]   ;;  %s1561_s9 = inlined_call_operand.hbm [shape: bf16[2,2,256], index: 9, kind: output, shape index: {1}]   ;;  %s1562_s10 = inlined_call_operand.hbm [shape: bf16[2,4,256], index: 10, kind: output, shape index: {2}]  }
   0x1   :  { %1571 = sst [smem:[#allocation20_spill]] %s1552_s0 }
   0x2   :  { %1572 = sst [smem:[#allocation21_spill]] %s1553_s1 }
   0x3   :  { %1573 = sst [smem:[#allocation22_spill]] %s1554_s2 }
   0x4   :  { %16 = vsyncpa [#allocation5], 0 }
   0x5   :  { %17 = vsyncpa [#allocation3], 0 }
   0x6   :  { %19 = vsyncpa [#allocation3 + $0x1], 0 }
   0x7   :  { %20 = vsyncpa [#allocation4], 0 }
   0x8   :  { %22 = vsyncpa [#allocation4 + $0x1], 0 }
   0x9   :  { %23 = vsyncpa [#allocation9], 0 }
   0xa   :  { %25 = vsyncpa [#allocation9 + $0x1], 0  ;;  %s1288_s13 = smov 0   ;;  %s1290_s14 = smov 0  }
   0xb   :  { %s1292_s15 = smov 0   ;;  %s1294_s16 = smov 0  }
   0xc   :  { %s1296_s17 = smov 0   ;;  %s1298_s18 = smov 0  }
   0xd LB: > { %1574 = sst [smem:[#allocation15_spill]] %s1204_s13  ;;  %s1319_s19 = sadd.s32 4294967295, %s1224_s18   ;;  %s1224_s18 = sphi %s1298_s18, %s31_s18   ;;  %s1220_s17 = sphi %s1296_s17, %s1598_s17   ;;  %s1216_s16 = sphi %s1294_s16, %s1597_s16   ;;  %s1212_s15 = sphi %s1292_s15, %s1601_s15   ;;  %s1208_s14 = sphi %s1290_s14, %s1600_s14   ;;  %s1204_s13 = sphi %s1288_s13, %s1599_s13  }
   0xe   : > { %1575 = sst [smem:[#allocation16_spill]] %s1220_s17  ;;  %s1563_s20 = sadd.s32 4294967294, %s1224_s18  }
   0xf   : > { %1576 = sst [smem:[#allocation17_spill]] %s1224_s18  ;;  %p86_p0 = scmp.ne.s32.totalorder %s1208_s14, %s1204_s13 }
  0x10   : > { %p1570_p1 = scmp.eq.s32.totalorder %s1319_s19, 0  ;;  %p244_p3 = scmp.eq.s32.totalorder %s1563_s20, 1 }
  0x11   : > { %p912_p5 = scmp.ge.s32.totalorder %s1224_s18, 1  ;;  %p307_p7 = scmp.lt.s32.totalorder %s1224_s18, 3 }
  0x12   : > { %p1330_p4 = por %p1570_p1, %p86_p0  ;;  %p1335_p6 = por %p244_p3, %p86_p0 }
  0x13   : > { %s1580_s0 = sld [smem:[#allocation20_spill]]  ;;  %p1343_p8 = pnand %p912_p5, %p307_p7 }
  0x14   : > { %s1578_s22 = scalar_select %p1335_p6, 1, 0 }
  0x15   : > { %p965_p10 = pneg %p1343_p8  ;;  %s43_s28 = sadd.s32 1, %s1220_s17 }
  0x16   : > { %1579 = sst [smem:[#allocation18_spill]] %s1578_s22  ;;  %s73_s29 = sadd.s32 1, %s1212_s15 }
  0x17   : > { %p1352_p11 = pnand %p965_p10, %p1570_p1  ;;  %p45_p12 = scmp.ge.s32.totalorder %s43_s28, 2 }
  0x19   : > { %s320_s25 = sshll.u32 %s1580_s0, 4  ;;  %p1043_p0 = pneg %p1352_p11  ;;  %s321_s25 = int_to_ptr.vmem [resolvable:$true] %s320_s25 }
  0x1a   : > { %s1041_s30 = scalar_lea.vmem %s321_s25, 16  ;;  %p1049_p7 = scmp.lt.s32.totalorder %s321_s25, %s321_s25 }
  0x1b   : > { %p1042_p13 = scmp.ne.s32.totalorder %s321_s25, %s1041_s30  ;;  %p1050_p2 = scmp.lt.s32.totalorder %s1041_s30, %s1041_s30 }
  0x1d   : > { %p1044_p3 = pnand %p1043_p0, %p1042_p13  ;;  %p1051_p9 = por %p1050_p2, %p1049_p7 }
  0x1f   : > { %p1045_p5 = pneg %p1044_p3 }
  0x21   : > { %p1052_p6 = pnand %p1051_p9, %p1045_p5 }
  0x23   : > { %1055 = shalt.err (!%p1052_p6)
}
  0x24   : > { %s1226_s11 = smov [#allocation2]   ;;  %s1603_s28 = smov (%p45_p12, %s43_s28), 0 }
  0x25   : > { %968 = dma.vmem_to_smem (!%p1352_p11), %s321_s25, 16, %s1226_s11, [#allocation5]  }
  0x26   : > { %1583 = sst [smem:[#allocation19_spill]] %s1603_s28  ;;  %p80_p10 = scmp.ne.s32.totalorder %s1212_s15, %s1208_s14 }
  0x27   : > { %p81_p2 = scmp.eq.s32.totalorder %s1224_s18, 0  ;;  %s68_s12 = ssub.s32 %s1220_s17, %s1603_s28 }
  0x28   : > { %p984_p6 = scmp.lt.s32.totalorder %s1224_s18, 2  ;;  %p71_p9 = scmp.eq.s32.totalorder %s68_s12, 0 }
  0x29   : > { %p82_p13 = por %p81_p2, %p80_p10  ;;  %p1584_p0 = scmp.eq.s32.totalorder %s1319_s19, 1 }
  0x2a   : > { %s349_s24 = sand.u32 1, %s1212_s15   ;;  %s949_s20 = sshll.u32 %s1220_s17, 7 }
  0x2b   : > { %p1372_p3 = por %p1584_p0, %p80_p10  ;;  %s915_s30 = sshll.u32 %s349_s24, 3 }
  0x2c   : > { %s1378_s27 = scalar_select %p71_p9, %s1212_s15, %s73_s29  }
  0x2d   : > { %s1586_s1 = sld [smem:[#allocation21_spill]]  ;;  %s353_s22 = scalar_lea.vmem [#allocation6], %s915_s30 }
  0x2e   : > { %s363_s13 = sshll.u32 %s353_s22, 4  ;;  %p1384_p11 = pnand %p984_p6, %p82_p13  ;;  %s364_s13 = int_to_ptr.vmem [resolvable:$true] %s363_s13 }
  0x2f   : > { %s350_s28 = scalar_lea.sflag [#allocation3], %s349_s24  ;;  %s1069_s18 = scalar_lea.vmem %s364_s13, 128 }
  0x30   : > { %p1058_p12 = pneg %p1384_p11  ;;  %p1070_p5 = scmp.ne.s32.totalorder %s364_s13, %s1069_s18 }
  0x31   : > { %s1227_s29 = smov [#allocation6]  }
  0x32   : > { %p1072_p7 = pnand %p1070_p5, %p1058_p12  ;;  %s1074_s17 = sshll.u32 %s1227_s29, 4  ;;  %s1075_s17 = int_to_ptr.vmem [resolvable:$false] %s1074_s17 }
  0x33   : > { %s361_s0 = scalar_lea.hbm %s1586_s1, %s949_s20  ;;  %s1076_s25 = scalar_lea.vmem %s1075_s17, 256 }
  0x34   : > { %p1073_p10 = pneg %p1072_p7  ;;  %p1077_p2 = scmp.lt.s32.totalorder %s364_s13, %s1075_s17 }
  0x35   : > { %p1078_p9 = scmp.lt.s32.totalorder %s1076_s25, %s1069_s18 }
  0x37   : > { %p1079_p0 = por %p1078_p9, %p1077_p2 }
  0x39   : > { %p1080_p1 = pnand %p1079_p0, %p1073_p10 }
  0x3b   : > { %1083 = shalt.err (!%p1080_p1)
}
  0x3c   : > { %972 = dma.hbm_to_vmem [thread:$0]  (!%p1384_p11), %s361_s0, 128, %s364_s13, %s350_s28  }
  0x3d   : > { %372 = sbr.rel (%p1343_p8) target bundleno = 353 (0x161), region = 52  ;;  %p1588_p6 = scmp.eq.s32.totalorder (!%p1343_p8), %s1319_s19, 0 }
  0x42   : > { %1187 = dma.done.wait (%p1588_p6), [#allocation5], 16   ;;  %p1589_p13 = pmov %p1588_p6 }
  0x43   : > { %s1399_s20 = sand.u32 1, %s1208_s14  }
  0x44   : > { %1189 = vsyncadd (%p1589_p13), [#allocation5], 4294967280  ;;  %s920_s17 = sshll.u32 %s1399_s20, 3  ;;  %s379_s18 = scalar_lea.sflag [#allocation3], %s1399_s20 }
  0x45   : > { %s382_s22 = scalar_lea.vmem [#allocation6], %s920_s17 }
  0x46   : > { %1191 = dma.done.wait (%p1330_p4), %s379_s18, 128  }
  0x47   : > { %1193 = vsyncadd (%p1330_p4), %s379_s18, 4294967168 }
  0x48   : > { %387 = sfence }
  0x49   : > { %v435_v0 = vld [vmem:[%s382_s22] sm:$0xff]  ;;  %vm453_vm0 = vcmask 1041408   ;;  %v1228_v3 = vmov 0   ;;  %s1590_s2 = sld [smem:[#allocation22_spill]]  ;;  %vm449_vm1 = vcmask 31744   ;;  %v518_v20 = vlaneseq  ;;  %s921_s13 = sshll.u32 %s1399_s20, 1 }
  0x4a   : > { %v437_v1 = vcombine.high %v435_v0, %v435_v0  ;;  %v439_v2 = vpack.c.bf16 %v435_v0, %v435_v0  ;;  %492 = vmatprep.mubr.bf16.mxu0 %v1228_v3  ;;  %574 = vmatprep.mubr.bf16.mxu1 %v1228_v3  ;;  %v533_v4 = vld [vmem:[%s1557_s5] sm:$0x3]  ;;  %s1429_s18 = sld [smem:[#allocation2 + $0x1]]  ;;  %v1229_v18 = vmov 1966171168   ;;  %s693_s26 = sand.u32 1, %s1319_s19  }
  0x4b   : > { %1038 = vset.pattern.permute.xlu0 %v1228_v3  ;;  %1039 = vset.pattern.permute.xlu1 %v1228_v3  ;;  %v615_v5 = vld [vmem:[%s1559_s7] sm:$0xf]  ;;  %s1431_s22 = sld [smem:[#allocation2]]  ;;  %v516_v19 = vunpack.c.l.s4 %v1229_v18  ;;  %v519_v35 = vshrl.u32 %v518_v20, 7  ;;  %s950_s28 = sshll.u32 %s1216_s16, 5 }
  0x4c   : > { %v440_v6 = vpack.c.bf16 %v437_v1, %v437_v1  ;;  %v455_v7 = vsel %vm453_vm0, %v439_v2, 0  ;;  %536 = vperm.xlu0 %1038, %v533_v4   ;;  %618 = vperm.xlu1 %1039, %v615_v5   ;;  %v443_v8 = vld [vmem:[%s1555_s3] sm:$0x3]  ;;  %s1434_s0 = sld [smem:[#allocation2 + $0x2]]  ;;  %s923_s21 = sshll.u32 %s1399_s20, 2 }
  0x4d   : > { %v532_v10 = vld [vmem:[%s1556_s4] sm:$0x1]  ;;  %v517_v34 = vunpack.c.0.s8 %v516_v19  ;;  %s422_s24 = scalar_lea.vmem [#allocation8], %s921_s13  ;;  %s415_s11 = scalar_lea.vmem [#allocation7], %s921_s13 }
  0x4e   : > { %924 = vmatprep.subr.msk.bf16.mxu0 %vm453_vm0, %v440_v6  ;;  %929 = vmatprep.subr.msk.bf16.mxu1 %vm453_vm0, %v440_v6  ;;  %v614_v11 = vld [vmem:[%s1558_s6] sm:$0x3]  ;;  %s731_s30 = sshll.u32 %s422_s24, 4  ;;  %s715_s12 = sshll.u32 %s415_s11, 4  ;;  %s1447_s30 = int_to_ptr.vmem [resolvable:$true] %s731_s30  ;;  %s1454_s12 = int_to_ptr.vmem [resolvable:$true] %s715_s12 }
  0x4f   : > { %475 = vmatpush1.bf16.msra.mxu0 %v455_v7  ;;  %557 = vmatpush1.bf16.msra.mxu1 %v455_v7  ;;  %v442_v9 = vld [vmem:[%s1590_s2] sm:$0x1]  ;;  %v520_v49 = vsub.s32 %v517_v34, %v519_v35  ;;  %s1445_s17 = scalar_lea.hbm %s1561_s9, %s950_s28  ;;  %s952_s13 = sshll.u32 %s1216_s16, 6 }
  0x50   : > { %934 = vmatprep.subr.msk.bf16.mxu0 %vm453_vm0, %v440_v6  ;;  %446 = vperm.xlu0 %1038, %v443_v8   ;;  %v587_v21 = vstv %s1429_s18  ;;  %s1457_s29 = scalar_lea.vmem [#allocation10], %s923_s21  ;;  %s1462_s1 = scalar_lea.sflag [#allocation9], %s693_s26 }
  0x51   : > { %v505_v25 = vstv %s1431_s22  ;;  %s747_s25 = sshll.u32 %s1457_s29, 4  ;;  %s1084_s2 = scalar_lea.vmem %s1447_s30, 32  ;;  %s748_s25 = int_to_ptr.vmem [resolvable:$true] %s747_s25 }
  0x52   : > { %925 = vmatmul.mubr.msk.bf16.vlgmr.msra.gmra.mxu0 %vm449_vm1, %v442_v9  ;;  %930 = vmatmul.mubr.msk.bf16.vlgmr.msra.gmra.mxu1 %vm449_vm1, %v532_v10  ;;  %v669_v53 = vstv %s1434_s0  ;;  %s1452_s0 = scalar_lea.hbm %s1560_s8, %s950_s28  ;;  %p1085_p1 = scmp.ne.s32.totalorder %s1447_s30, %s1084_s2 }
  0x53   : > { %639 = vmatpush1.bf16.msra.mxu0 %v455_v7  ;;  %656 = vmatprep.mubr.bf16.mxu0 %v1228_v3  ;;  %s1230_s28 = smov [#allocation8]  }
  0x54   : > { %p1086_p4 = pnand %p1085_p1, %p1372_p3  ;;  %s1088_s18 = sshll.u32 %s1230_s28, 4  ;;  %s1089_s18 = int_to_ptr.vmem [resolvable:$false] %s1088_s18 }
  0x55   : > { %p1091_p11 = scmp.lt.s32.totalorder %s1447_s30, %s1089_s18 }
  0x56   : > { %p1087_p8 = pneg %p1086_p4 }
  0x5a   : > { %935 = vmatmul.mubr.msk.bf16.vlgmr.msra.gmra.mxu0 %vm449_vm1, %v614_v11 }
  0xc7   : > { %v537_v12 = vpop.permute.xlu0 %536  ;;  %v619_v33 = vpop.permute.xlu1 %618 }
  0xcb   : > { %v447_v13 = vpop.permute.xlu0 %446 }
 0x112   : > { %v494_v14 = vpop.f32.mrf.mxu0  ;;  %v576_v15 = vpop.f32.mrf.mxu1 }
 0x113   : > { %v495_v16 = vadd.f32 %v494_v14, %v447_v13  ;;  %v577_v17 = vadd.f32 %v576_v15, %v537_v12 }
 0x114   : > { %v496_v22 = vpop.f32.mrf.mxu0  ;;  %v578_v23 = vpop.f32.mrf.mxu1 }
 0x115   : > { %v503_v24 = vmin.f32 %v495_v16, 0.0  ;;  %v585_v26 = vmin.f32 %v577_v17, 0.0  ;;  %v583_v27 = vmax.f32 %v577_v17, 0.0  ;;  %v497_v28 = vadd.f32 %v496_v22, %v447_v13 }
 0x116   : > { %v579_v29 = vadd.f32 %v578_v23, %v537_v12  ;;  %v498_v30 = vpop.f32.mrf.mxu0  ;;  %v580_v31 = vpop.f32.mrf.mxu1  ;;  %v501_v42 = vmax.f32 %v495_v16, 0.0 }
 0x117   : > { %v588_v32 = vmul.f32 %v587_v21, %v585_v26  ;;  %v506_v36 = vmul.f32 %v505_v25, %v503_v24  ;;  %v504_v37 = vmin.f32 %v497_v28, 0.0  ;;  %v502_v44 = vmax.f32 %v497_v28, 0.0 }
 0x118   : > { %v584_v38 = vmax.f32 %v579_v29, 0.0  ;;  %v586_v39 = vmin.f32 %v579_v29, 0.0  ;;  %v499_v40 = vpop.f32.mrf.mxu0  ;;  %v581_v41 = vpop.f32.mrf.mxu1 }
 0x119   : > { %v590_v43 = vadd.f32 %v588_v32, %v583_v27  ;;  %v507_v45 = vmul.f32 %v505_v25, %v504_v37  ;;  %v508_v50 = vadd.f32 %v506_v36, %v501_v42 }
 0x11a   : > { %v589_v46 = vmul.f32 %v587_v21, %v586_v39  ;;  %v658_v47 = vpop.f32.mrf.mxu0 }
 0x11b   : > { %v659_v48 = vadd.f32 %v658_v47, %v619_v33  ;;  %v509_v51 = vadd.f32 %v507_v45, %v502_v44 }
 0x11c   : > { %v591_v52 = vadd.f32 %v589_v46, %v584_v38  ;;  %v660_v54 = vpop.f32.mrf.mxu0 }
 0x11d   : > { %v667_v55 = vmin.f32 %v659_v48, 0.0  ;;  %v661_v56 = vadd.f32 %v660_v54, %v619_v33  ;;  %v926_v57 = vpack.c.bf16 %v509_v51, %v508_v50  ;;  %v665_v1 = vmax.f32 %v659_v48, 0.0 }
 0x11e   : > { %v931_v58 = vpack.c.bf16 %v591_v52, %v590_v43  ;;  %v662_v59 = vpop.f32.mrf.mxu0 }
 0x11f   : > { %v670_v60 = vmul.f32 %v669_v53, %v667_v55  ;;  %v668_v61 = vmin.f32 %v661_v56, 0.0  ;;  %v521_v0 = vrot.slane %v926_v57, %v520_v49  ;;  %v666_v2 = vmax.f32 %v661_v56, 0.0 }
 0x120   : > { %v663_v62 = vpop.f32.mrf.mxu0  ;;  %v603_v63 = vrot.slane %v931_v58, %v520_v49 }
 0x121   : > { %v671_v3 = vmul.f32 %v669_v53, %v668_v61  ;;  %927 = vst.sshfl [vmem:[%s415_s11] sm:$0x5 pattern:$0x73625140] %v521_v0  ;;  %v672_v4 = vadd.f32 %v670_v60, %v665_v1 }
 0x122   : > { %932 = vst.sshfl [vmem:[%s422_s24] sm:$0x5 pattern:$0x73625140] %v603_v63  ;;  %s1090_s24 = scalar_lea.vmem %s1089_s18, 64 }
 0x123   : > { %v673_v5 = vadd.f32 %v671_v3, %v666_v2  ;;  %p1092_p12 = scmp.lt.s32.totalorder %s1090_s24, %s1084_s2 }
 0x125   : > { %p1093_p5 = por %p1092_p12, %p1091_p11 }
 0x127   : > { %p1094_p7 = pnand %p1093_p5, %p1087_p8 }
 0x129   : > { %1097 = shalt.err (!%p1094_p7)
}
 0x12a   : > { %s1098_s19 = scalar_lea.hbm %s1445_s17, 32  ;;  %s1102_s11 = scalar_lea.hbm %s1561_s9, 64 }
 0x12b   : > { %p1099_p10 = scmp.ne.s32.totalorder %s1445_s17, %s1098_s19  ;;  %p1103_p0 = scmp.lt.s32.totalorder %s1445_s17, %s1561_s9 }
 0x12c   : > { %p1104_p6 = scmp.lt.s32.totalorder %s1102_s11, %s1098_s19 }
 0x12d   : > { %p1100_p2 = pnand %p1099_p10, %p1372_p3 }
 0x12e   : > { %p1105_p13 = por %p1104_p6, %p1103_p0 }
 0x12f   : > { %p1101_p9 = pneg %p1100_p2 }
 0x131   : > { %p1106_p1 = pnand %p1105_p13, %p1101_p9 }
 0x133   : > { %1109 = shalt.err (!%p1106_p1)
}
 0x134   : > { %960 = dma.vmem_to_hbm [thread:$0]  (%p1372_p3), %s1447_s30, 32, %s1445_s17, %s1462_s1  }
 0x135   : > { %s689_s2 = scalar_lea.sflag [#allocation4], %s1399_s20  ;;  %s1110_s18 = scalar_lea.vmem %s1454_s12, 32 }
 0x136   : > { %p1111_p4 = scmp.ne.s32.totalorder %s1454_s12, %s1110_s18  ;;  %s1231_s24 = smov [#allocation7]  }
 0x137   : > { %s1114_s19 = sshll.u32 %s1231_s24, 4  ;;  %s1115_s19 = int_to_ptr.vmem [resolvable:$false] %s1114_s19 }
 0x138   : > { %p1112_p8 = pnand %p1111_p4, %p1372_p3  ;;  %s1116_s26 = scalar_lea.vmem %s1115_s19, 64 }
 0x139   : > { %p1117_p12 = scmp.lt.s32.totalorder %s1454_s12, %s1115_s19  ;;  %p1118_p5 = scmp.lt.s32.totalorder %s1116_s26, %s1110_s18 }
 0x13a   : > { %p1113_p11 = pneg %p1112_p8 }
 0x13b   : > { %p1119_p7 = por %p1118_p5, %p1117_p12 }
 0x13d   : > { %p1120_p10 = pnand %p1119_p7, %p1113_p11 }
 0x13f   : > { %1123 = shalt.err (!%p1120_p10)
}
 0x140   : > { %s1124_s30 = scalar_lea.hbm %s1452_s0, 32  ;;  %s1128_s21 = scalar_lea.hbm %s1560_s8, 64 }
 0x141   : > { %p1125_p2 = scmp.ne.s32.totalorder %s1452_s0, %s1124_s30  ;;  %p1129_p6 = scmp.lt.s32.totalorder %s1452_s0, %s1560_s8 }
 0x142   : > { %p1130_p13 = scmp.lt.s32.totalorder %s1128_s21, %s1124_s30 }
 0x143   : > { %p1126_p9 = pnand %p1125_p2, %p1372_p3 }
 0x144   : > { %p1131_p1 = por %p1130_p13, %p1129_p6 }
 0x145   : > { %p1127_p0 = pneg %p1126_p9 }
 0x147   : > { %p1132_p4 = pnand %p1131_p1, %p1127_p0 }
 0x149   : > { %1135 = shalt.err (!%p1132_p4)
}
 0x14a   : > { %959 = dma.vmem_to_hbm [thread:$0]  (%p1372_p3), %s1454_s12, 32, %s1452_s0, %s689_s2   ;;  %v936_v6 = vpack.c.bf16 %v673_v5, %v672_v4 }
 0x14b   : > { %s745_s24 = scalar_lea.hbm %s1562_s10, %s952_s13  ;;  %s1136_s19 = scalar_lea.vmem %s748_s25, 64 }
 0x14c   : > { %937 = vst.sshfl [vmem:[%s1457_s29] sm:$0x33 pattern:$0x76325410] %v936_v6  ;;  %p1137_p8 = scmp.ne.s32.totalorder %s748_s25, %s1136_s19  ;;  %s1232_s26 = smov [#allocation10]  }
 0x14d   : > { %s1140_s30 = sshll.u32 %s1232_s26, 4  ;;  %s1141_s30 = int_to_ptr.vmem [resolvable:$false] %s1140_s30 }
 0x14e   : > { %p1138_p11 = pnand %p1137_p8, %p1372_p3  ;;  %s1142_s20 = scalar_lea.vmem %s1141_s30, 128 }
 0x14f   : > { %p1143_p5 = scmp.lt.s32.totalorder %s748_s25, %s1141_s30  ;;  %p1144_p7 = scmp.lt.s32.totalorder %s1142_s20, %s1136_s19 }
 0x150   : > { %p1139_p12 = pneg %p1138_p11 }
 0x151   : > { %p1145_p10 = por %p1144_p7, %p1143_p5 }
 0x153   : > { %p1146_p2 = pnand %p1145_p10, %p1139_p12 }
 0x155   : > { %1149 = shalt.err (!%p1146_p2)
}
 0x156   : > { %s1150_s16 = scalar_lea.hbm %s745_s24, 64  ;;  %s1154_s13 = scalar_lea.hbm %s1562_s10, 128 }
 0x157   : > { %p1151_p9 = scmp.ne.s32.totalorder %s745_s24, %s1150_s16  ;;  %p1155_p13 = scmp.lt.s32.totalorder %s745_s24, %s1562_s10 }
 0x158   : > { %p1156_p1 = scmp.lt.s32.totalorder %s1154_s13, %s1150_s16 }
 0x159   : > { %p1152_p0 = pnand %p1151_p9, %p1372_p3 }
 0x15a   : > { %p1157_p4 = por %p1156_p1, %p1155_p13 }
 0x15b   : > { %p1153_p6 = pneg %p1152_p0 }
 0x15d   : > { %p1158_p8 = pnand %p1157_p4, %p1153_p6 }
 0x15f   : > { %1161 = shalt.err (!%p1158_p8)
}
 0x160   : > { %961 = dma.vmem_to_hbm [thread:$0]  (%p1372_p3), %s748_s25, 64, %s745_s24, %s1462_s1  }
 0x161 PF: > { %s1591_s17 = sld [smem:[#allocation15_spill]] }
 0x162   : > { %s1592_s21 = sld [smem:[#allocation18_spill]] }
 0x163   : > { %s1593_s11 = sld [smem:[#allocation17_spill]] }
 0x167   : > { %s759_s22 = sand.u32 1, %s1591_s17  }
 0x168   : > { %p1594_p11 = scmp.ne.s32.totalorder %s1592_s21, 0  ;;  %s760_s28 = scalar_lea.sflag [#allocation4], %s759_s22 }
 0x169   : > { %p1595_p12 = scmp.ge.s32.totalorder %s1593_s11, 2 }
 0x16b   : > { %p974_p5 = pnand %p1595_p12, %p1594_p11 }
 0x16d   : > { %p975_p7 = pneg %p974_p5 }
 0x16f   : > { %1195 = dma.done.wait (%p975_p7), %s760_s28, 32  }
 0x170   : > { %1197 = vsyncadd (%p975_p7), %s760_s28, 4294967264  ;;  %s1596_s18 = sadd.s32 4294967294, %s1593_s11  }
 0x171   : > { %s768_s19 = sand.u32 1, %s1596_s18  }
 0x172   : > { %s769_s26 = scalar_lea.sflag [#allocation9], %s768_s19 }
 0x173   : > { %1199 = dma.done.wait (%p975_p7), %s769_s26, 96  }
 0x174   : > { %1201 = vsyncadd (%p975_p7), %s769_s26, 4294967200  ;;  %s31_s18 = sadd.s32 1, %s1593_s11   ;;  %s1597_s16 = sld [smem:[#allocation16_spill]] }
 0x175   : > { %p28_p3 = scmp.ge.s32.totalorder %s31_s18, 4   ;;  %s1598_s17 = sld [smem:[#allocation19_spill]] }
 0x176   : > { %s1599_s13 = smov %s1208_s14  ;;  %s1600_s14 = smov %s1212_s15 }
 0x177   : > { %s1601_s15 = smov %s1378_s27  ;;  %30 = sbr.rel (!%p28_p3) target bundleno = 13 (0xd), region = 134 }
 0x17c   :  { %783 = vsyncpa [#allocation3], 1 }
 0x17d   :  { %785 = vsyncpa [#allocation3 + $0x1], 1 }
 0x17e   :  { %786 = vsyncpa [#allocation4], 1 }
 0x17f   :  { %788 = vsyncpa [#allocation4 + $0x1], 1 }
 0x180   :  { %789 = vsyncpa [#allocation9], 1 }
 0x181   :  { %791 = vsyncpa [#allocation9 + $0x1], 1 }
 0x182   :  { %792 = vsyncpa [#allocation5], 1 }
 0x183   :  { %794 = vsyncpa [#allocation5 + $0x1], 1 }

</bundles_post_ra>
